<compile_context>
chip_gen: v6e
topology: v6e:2x2x1
jax: 0.10.0
libtpu: 0.0.40
codegen_flags: <defaults>
</compile_context>

<pallas_src>
import functools

import jax
import jax.numpy as jnp
from jax.experimental import pallas as pl
from jax.experimental.pallas import tpu as pltpu

_BN_EPS = 1e-5
_VMEM_LIMIT = 32 * 1024 * 1024   # scoped cap; safe on v5e/v6e (128 MiB) and v7x (64 MiB)
_MAX_TM = 1024                   # row-tile cap (multiple of 8)


def _round_up(x, m):
    return (x + m - 1) // m * m


def _tile_dims(R, CP):
    """Pick (RP, TM, TN, mt, nt).  TN is 256/512 (full MXU width on v6e/v7x);
    when mt == nt == 1 the row axis is split so both v7x TensorCores get work."""
    if CP <= 512:
        TN = CP
    elif CP % 512 == 0:
        TN = 512
    else:
        TN = 256
    nt = CP // TN

    RP8 = _round_up(max(R, 8), 8)
    TM = min(_MAX_TM, RP8)
    RP = _round_up(RP8, TM)
    mt = RP // TM
    if mt == 1 and nt == 1 and RP8 >= 16:
        TM = _round_up((RP8 + 1) // 2, 8)
        RP = _round_up(RP8, TM)
        mt = RP // TM
    return RP, TM, TN, mt, nt


# ---------------------------------------------------------------------------
# Kernel A: tiled conv-as-matmul  +  per-row-tile partial BN statistics
# ---------------------------------------------------------------------------
def _matmul_stats_kernel(p_ref, w_ref, y_ref, ssum_ref, ssq_ref, acc_ref):
    k = pl.program_id(2)

    @pl.when(k == 0)
    def _():
        acc_ref[...] = jnp.zeros_like(acc_ref)

    acc_ref[...] += jnp.dot(p_ref[...], w_ref[...],
                            preferred_element_type=jnp.float32)

    @pl.when(k == pl.num_programs(2) - 1)
    def _():
        acc = acc_ref[...]
        y_ref[...] = acc.astype(y_ref.dtype)
        # partial BN stats for this row tile (zero-padded rows contribute 0)
        ssum_ref[...] = jnp.sum(acc, axis=0, keepdims=True)[None]
        ssq_ref[...] = jnp.sum(acc * acc, axis=0, keepdims=True)[None]


def _im2col_bf16(x_nhwc, ksize, stride, pad, KP):
    """bf16 patch extraction with the K zero-pad folded into the concat.
    Returns (R, KP) bf16 patches and output spatial dims."""
    n, h, w, c = x_nhwc.shape
    x = x_nhwc.astype(jnp.bfloat16)
    if pad:
        x = jnp.pad(x, ((0, 0), (pad, pad), (pad, pad), (0, 0)))
    ho = (h + 2 * pad - ksize) // stride + 1
    wo = (w + 2 * pad - ksize) // stride + 1
    cols = []
    for kh in range(ksize):
        for kw in range(ksize):
            cols.append(x[:, kh:kh + stride * ho:stride,
                          kw:kw + stride * wo:stride, :])
    K = ksize * ksize * c
    if KP > K:
        cols.append(jnp.zeros((n, ho, wo, KP - K), jnp.bfloat16))
    patches = jnp.concatenate(cols, axis=-1)        # (kh, kw, c) channel order
    return patches.reshape(n * ho * wo, KP), (n, ho, wo)


def conv2d_stats(x_nhwc, w_oihw, stride, pad):
    """Conv (tiled MXU matmul, bf16 operands / f32 acc) + per-channel batch
    statistics.  Returns bf16 padded y (RP, CP), mean/var (CP,), dims, spatial."""
    cout, cin, ksize, _ = w_oihw.shape
    K = ksize * ksize * cin
    KP = _round_up(K, 256)                  # TK = 256: full v6e/v7x MXU width
    CP = _round_up(cout, 256)
    TK = 256
    kt = KP // TK

    patches, (n, ho, wo) = _im2col_bf16(x_nhwc, ksize, stride, pad, KP)
    R = n * ho * wo
    RP, TM, TN, mt, nt = _tile_dims(R, CP)
    if RP > R:
        patches = jnp.pad(patches, ((0, RP - R), (0, 0)))

    # torch (Cout, Cin, KH, KW) -> (KH*KW*Cin, Cout), matching im2col ordering
    w_flat = jnp.transpose(w_oihw, (2, 3, 1, 0)).reshape(K, cout)
    w = jnp.pad(w_flat, ((0, KP - K), (0, CP - cout))).astype(jnp.bfloat16)

    y, ssum, ssq = pl.pallas_call(
        _matmul_stats_kernel,
        out_shape=(jax.ShapeDtypeStruct((RP, CP), jnp.bfloat16),
                   jax.ShapeDtypeStruct((mt, 1, CP), jnp.float32),
                   jax.ShapeDtypeStruct((mt, 1, CP), jnp.float32)),
        grid_spec=pltpu.PrefetchScalarGridSpec(
            num_scalar_prefetch=0,
            grid=(mt, nt, kt),
            in_specs=[pl.BlockSpec((TM, TK), lambda i, j, k: (i, k)),
                      pl.BlockSpec((TK, TN), lambda i, j, k: (k, j))],
            out_specs=(pl.BlockSpec((TM, TN), lambda i, j, k: (i, j)),
                       pl.BlockSpec((1, 1, TN), lambda i, j, k: (i, 0, j)),
                       pl.BlockSpec((1, 1, TN), lambda i, j, k: (i, 0, j))),
            scratch_shapes=[pltpu.VMEM((TM, TN), jnp.float32)]),
        compiler_params=pltpu.CompilerParams(
            dimension_semantics=("parallel", "parallel", "arbitrary"),
            vmem_limit_bytes=_VMEM_LIMIT),
        cost_estimate=pl.CostEstimate(
            flops=2 * RP * KP * CP,
            transcendentals=0,
            bytes_accessed=(RP * KP * 2 * nt        # A streamed once per N tile
                            + KP * CP * 2 * mt      # B streamed once per M tile
                            + RP * CP * 2           # bf16 y write
                            + 2 * mt * CP * 4)),    # partial stats
    )(patches, w)

    # global-over-rows BN statistics (divide by the TRUE row count R)
    mean = jnp.sum(ssum[:, 0, :], axis=0) / R
    var = jnp.sum(ssq[:, 0, :], axis=0) / R - mean * mean
    var = jnp.maximum(var, 0.0)   # guard E[x^2] - mean^2 cancellation
    return y, mean, var, (RP, CP, TM, TN), (n, ho, wo)


def bn_fold(gamma, beta, mean, var, cout, CP):
    """Fold BN into per-channel scale/shift (padded channels -> 0/0)."""
    g = jnp.pad(gamma, (0, CP - cout))
    b = jnp.pad(beta, (0, CP - cout))
    scale = g * jax.lax.rsqrt(var + _BN_EPS)
    shift = b - mean * scale
    return scale.reshape(1, CP), shift.reshape(1, CP)


# ---------------------------------------------------------------------------
# Kernel B: element-wise epilogue  y*scale + shift  [+ residual] [ReLU]
#   res_mode: "none" | "identity" (out += r) | "affine" (out += r*rsc + rsh)
# ---------------------------------------------------------------------------
def _make_bn_act_kernel(res_mode, relu):
    def kernel(*refs):
        if res_mode == "affine":
            y_ref, sc_ref, sh_ref, r_ref, rsc_ref, rsh_ref, o_ref = refs
        elif res_mode == "identity":
            y_ref, sc_ref, sh_ref, r_ref, o_ref = refs
        else:
            y_ref, sc_ref, sh_ref, o_ref = refs
        out = y_ref[...].astype(jnp.float32) * sc_ref[...] + sh_ref[...]
        if res_mode == "affine":
            out = out + (r_ref[...].astype(jnp.float32) * rsc_ref[...] + rsh_ref[...])
        elif res_mode == "identity":
            out = out + r_ref[...].astype(jnp.float32)
        if relu:
            out = jnp.maximum(out, 0.0)
        o_ref[...] = out.astype(o_ref.dtype)
    return kernel


def bn_act(y, scale, shift, dims, residual=None, res_scale=None,
           res_shift=None, relu=True, res_mode="none", out_dtype=jnp.float32):
    RP, CP, TM, TN = dims
    mt, nt = RP // TM, CP // TN

    tile = pl.BlockSpec((TM, TN), lambda i, j: (i, j))
    vec = pl.BlockSpec((1, TN), lambda i, j: (0, j))
    in_specs = [tile, vec, vec]
    inputs = [y, scale, shift]
    if res_mode == "affine":
        in_specs += [tile, vec, vec]
        inputs += [residual, res_scale, res_shift]
    elif res_mode == "identity":
        in_specs += [tile]
        inputs += [residual]

    in_bytes = y.size * y.dtype.itemsize
    if residual is not None:
        in_bytes += residual.size * residual.dtype.itemsize
    out_bytes = RP * CP * jnp.dtype(out_dtype).itemsize
    flops_per = {"affine": 6, "identity": 4, "none": 3}[res_mode]

    return pl.pallas_call(
        _make_bn_act_kernel(res_mode, relu),
        out_shape=jax.ShapeDtypeStruct((RP, CP), out_dtype),
        grid_spec=pltpu.PrefetchScalarGridSpec(
            num_scalar_prefetch=0,
            grid=(mt, nt),
            in_specs=in_specs,
            out_specs=tile),
        compiler_params=pltpu.CompilerParams(
            dimension_semantics=("parallel", "parallel"),
            vmem_limit_bytes=_VMEM_LIMIT),
        cost_estimate=pl.CostEstimate(
            flops=flops_per * RP * CP,
            transcendentals=0,
            bytes_accessed=in_bytes + out_bytes),
    )(*inputs)


# ---------------------------------------------------------------------------
# BasicBlock forward (NHWC in / NHWC out)
# ---------------------------------------------------------------------------
@functools.partial(jax.jit, static_argnames=("stride",))
def basic_block_forward(x_nhwc, params, stride):
    n, h, w, cin = x_nhwc.shape
    cout = params["conv1_w"].shape[0]

    # ---- conv1 -> bn1 -> relu (bf16 out: feeds conv2's im2col directly) ----
    y1, mean1, var1, dims1, (_, ho, wo) = conv2d_stats(
        x_nhwc, params["conv1_w"], stride, 1)
    R = n * ho * wo
    sc1, sh1 = bn_fold(params["bn1_g"], params["bn1_b"], mean1, var1, cout, dims1[1])
    y1n = bn_act(y1, sc1, sh1, dims1, relu=True, out_dtype=jnp.bfloat16)
    y1_img = y1n[:R, :cout].reshape(n, ho, wo, cout)

    # ---- conv2 (matmul + stats) ----
    y2, mean2, var2, dims2, _ = conv2d_stats(y1_img, params["conv2_w"], 1, 1)
    RP2, CP2 = dims2[0], dims2[1]
    sc2, sh2 = bn_fold(params["bn2_g"], params["bn2_b"], mean2, var2, cout, CP2)

    # ---- bn2 + shortcut + relu in a single element-wise pass ----
    if stride != 1 or cin != cout:
        # projection shortcut; its BN is folded into conv2's epilogue
        ysc, mean_s, var_s, dims_s, _ = conv2d_stats(
            x_nhwc, params["sc_w"], stride, 0)
        assert dims_s[:2] == dims2[:2], (dims_s, dims2)
        rsc, rsh = bn_fold(params["sc_g"], params["sc_b"], mean_s, var_s, cout, CP2)
        out = bn_act(y2, sc2, sh2, dims2, residual=ysc, res_scale=rsc,
                     res_shift=rsh, relu=True, res_mode="affine")
    else:
        # identity shortcut: bf16 residual, no per-channel FMA in the epilogue
        res = jnp.pad(x_nhwc.reshape(R, cin).astype(jnp.bfloat16),
                      ((0, RP2 - R), (0, CP2 - cin)))
        out = bn_act(y2, sc2, sh2, dims2, residual=res, relu=True,
                     res_mode="identity")

    return out[:R, :cout].reshape(n, ho, wo, cout)


# ---------------------------------------------------------------------------
# Pure-JAX reference (sanity check of the Pallas path)
# ---------------------------------------------------------------------------
def _ref_conv(x, w_oihw, stride, pad):
    w = jnp.transpose(w_oihw, (2, 3, 1, 0))  # HWIO
    return jax.lax.conv_general_dilated(
        x, w, (stride, stride), [(pad, pad), (pad, pad)],
        dimension_numbers=("NHWC", "HWIO", "NHWC"))


def _ref_bn(y, g, b):
    mu = jnp.mean(y, axis=(0, 1, 2), keepdims=True)
    var = jnp.mean(jnp.square(y - mu), axis=(0, 1, 2), keepdims=True)
    return (y - mu) * jax.lax.rsqrt(var + _BN_EPS) * g + b


def basic_block_reference(x, params, stride):
    cin = x.shape[-1]
    cout = params["conv1_w"].shape[0]
    y = jax.nn.relu(_ref_bn(_ref_conv(x, params["conv1_w"], stride, 1),
                            params["bn1_g"], params["bn1_b"]))
    y = _ref_bn(_ref_conv(y, params["conv2_w"], 1, 1),
                params["bn2_g"], params["bn2_b"])
    if stride != 1 or cin != cout:
        sc = _ref_bn(_ref_conv(x, params["sc_w"], stride, 0),
                     params["sc_g"], params["sc_b"])
    else:
        sc = x
    return jax.nn.relu(y + sc)


# ---------------------------------------------------------------------------
# Deterministic parameter init (shapes per BasicBlock.__init__)
# ---------------------------------------------------------------------------
def init_params(key, in_channels, out_channels, stride):
    ks = jax.random.split(key, 8)
    params = {
        "conv1_w": 0.1 * jax.random.normal(ks[0], (out_channels, in_channels, 3, 3), jnp.float32),
        "bn1_g": 1.0 + 0.1 * jax.random.normal(ks[1], (out_channels,), jnp.float32),
        "bn1_b": 0.1 * jax.random.normal(ks[2], (out_channels,), jnp.float32),
        "conv2_w": 0.1 * jax.random.normal(ks[3], (out_channels, out_channels, 3, 3), jnp.float32),
        "bn2_g": 1.0 + 0.1 * jax.random.normal(ks[4], (out_channels,), jnp.float32),
        "bn2_b": 0.1 * jax.random.normal(ks[5], (out_channels,), jnp.float32),
    }
    if stride != 1 or in_channels != out_channels:
        params["sc_w"] = 0.1 * jax.random.normal(ks[6], (out_channels, in_channels, 1, 1), jnp.float32)
        params["sc_g"] = 1.0 + 0.05 * jax.random.normal(ks[7], (out_channels,), jnp.float32)
        params["sc_b"] = jnp.zeros((out_channels,), jnp.float32)
    return params


if __name__ == "__main__":
    key = jax.random.PRNGKey(0)
    k_x, k_p = jax.random.split(key)

    # batch=2, in_channels=4, out_channels=8, spatial=16, stride=2
    # (stride=2 / channel change exercises the projection shortcut)
    N, CIN, COUT, H, W, STRIDE = 2, 4, 8, 16, 16, 2

    x_nchw = jax.random.normal(k_x, (N, CIN, H, W), jnp.float32)   # PyTorch layout
    x_nhwc = jnp.transpose(x_nchw, (0, 2, 3, 1))                    # kernel layout
    params = init_params(k_p, CIN, COUT, STRIDE)

    out_nhwc = basic_block_forward(x_nhwc, params, stride=STRIDE)
    out_nhwc = jax.block_until_ready(out_nhwc)
    out_nchw = jnp.transpose(out_nhwc, (0, 3, 1, 2))  # back to PyTorch NCHW

    # sanity check against pure-JAX f32 reference (kernel uses bf16 MXU operands
    # and bf16 intermediates)
    ref = jax.block_until_ready(basic_block_reference(x_nhwc, params, STRIDE))
    max_diff = float(jnp.max(jnp.abs(out_nhwc - ref)))
    assert out_nchw.shape == (N, COUT, H // STRIDE, W // STRIDE), out_nchw.shape
    assert max_diff < 1e-1, f"max diff {max_diff}"

    print("KERNEL_OK")
</pallas_src>

<mosaic_0001>
module attributes {stable_mosaic.version = 11 : i64} {
  func.func @_matmul_stats_kernel(%arg0: i32, %arg1: i32, %arg2: i32, %arg3: memref<64x256xbf16, #tpu.memory_space<vmem>>, %arg4: memref<256x256xbf16, #tpu.memory_space<vmem>>, %arg5: memref<64x256xbf16, #tpu.memory_space<vmem>>, %arg6: memref<1x1x256xf32, #tpu.memory_space<vmem>>, %arg7: memref<1x1x256xf32, #tpu.memory_space<vmem>>, %arg8: memref<64x256xf32, #tpu.memory_space<vmem>>) attributes {dimension_semantics = [#tpu.dimension_semantics<parallel>, #tpu.dimension_semantics<parallel>, #tpu.dimension_semantics<arbitrary>], iteration_bounds = array<i64: 2, 1, 1>, scalar_prefetch = 0 : i64, scratch_operands = 1 : i64, tpu.core_type = #tpu.core_type<tc>, window_params = [{transform_indices = @transform_0, window_bounds = array<i64: 64, 256>}, {transform_indices = @transform_1, window_bounds = array<i64: 256, 256>}, {transform_indices = @transform_2, window_bounds = array<i64: 64, 256>}, {transform_indices = @transform_3, window_bounds = array<i64: 1, 1, 256>}, {transform_indices = @transform_4, window_bounds = array<i64: 1, 1, 256>}]} {
    %c0_i32 = arith.constant 0 : i32
    %0 = arith.cmpi eq, %arg2, %c0_i32 : i32
    %1 = arith.extui %0 : i1 to i32
    %c0_i32_0 = arith.constant 0 : i32
    %2 = arith.cmpi ne, %1, %c0_i32_0 : i32
    scf.if %2 {
      %cst_10 = arith.constant 0.000000e+00 : f32
      %12 = vector.broadcast %cst_10 : f32 to vector<64x256xf32>
      %c0_11 = arith.constant 0 : index
      %c0_12 = arith.constant 0 : index
      %13 = vector.load %arg8[%c0_11, %c0_12] : memref<64x256xf32, #tpu.memory_space<vmem>>, vector<64x256xf32>
      tpu.vector_store %arg8[%c0_11, %c0_12], %12 {strides = array<i32>} : memref<64x256xf32, #tpu.memory_space<vmem>>, vector<64x256xf32>,
    } else {
    }
    %c0 = arith.constant 0 : index
    %c0_1 = arith.constant 0 : index
    %3 = vector.load %arg8[%c0, %c0_1] : memref<64x256xf32, #tpu.memory_space<vmem>>, vector<64x256xf32>
    %c0_2 = arith.constant 0 : index
    %c0_3 = arith.constant 0 : index
    %4 = vector.load %arg3[%c0_2, %c0_3] : memref<64x256xbf16, #tpu.memory_space<vmem>>, vector<64x256xbf16>
    %c0_4 = arith.constant 0 : index
    %c0_5 = arith.constant 0 : index
    %5 = vector.load %arg4[%c0_4, %c0_5] : memref<256x256xbf16, #tpu.memory_space<vmem>>, vector<256x256xbf16>
    %cst = arith.constant dense<0.000000e+00> : vector<64x256xf32>
    %6 = tpu.matmul %4, %5, %cst {dimension_numbers = #tpu.dot_dimension_numbers<[1], [0], [0], [1], [0, 0, 1, 1], [], []>} : vector<64x256xbf16>, vector<256x256xbf16>, vector<64x256xf32> -> vector<64x256xf32>
    %7 = arith.addf %3, %6 : vector<64x256xf32>
    %c0_6 = arith.constant 0 : index
    %c0_7 = arith.constant 0 : index
    %8 = vector.load %arg8[%c0_6, %c0_7] : memref<64x256xf32, #tpu.memory_space<vmem>>, vector<64x256xf32>
    tpu.vector_store %arg8[%c0_6, %c0_7], %7 {strides = array<i32>} : memref<64x256xf32, #tpu.memory_space<vmem>>, vector<64x256xf32>,
    %c0_i32_8 = arith.constant 0 : i32
    %9 = arith.cmpi eq, %arg2, %c0_i32_8 : i32
    %10 = arith.extui %9 : i1 to i32
    %c0_i32_9 = arith.constant 0 : i32
    %11 = arith.cmpi ne, %10, %c0_i32_9 : i32
    scf.if %11 {
      %c0_10 = arith.constant 0 : index
      %c0_11 = arith.constant 0 : index
      %12 = vector.load %arg8[%c0_10, %c0_11] : memref<64x256xf32, #tpu.memory_space<vmem>>, vector<64x256xf32>
      %13 = arith.truncf %12 : vector<64x256xf32> to vector<64x256xbf16>
      %c0_12 = arith.constant 0 : index
      %c0_13 = arith.constant 0 : index
      %14 = vector.load %arg5[%c0_12, %c0_13] : memref<64x256xbf16, #tpu.memory_space<vmem>>, vector<64x256xbf16>
      tpu.vector_store %arg5[%c0_12, %c0_13], %13 {strides = array<i32>} : memref<64x256xbf16, #tpu.memory_space<vmem>>, vector<64x256xbf16>,
      %cst_14 = arith.constant dense<0.000000e+00> : vector<256xf32>
      %15 = vector.multi_reduction <add>, %12, %cst_14 [0] : vector<64x256xf32> to vector<256xf32>
      %16 = vector.shape_cast %15 : vector<256xf32> to vector<1x256xf32>
      %17 = vector.shape_cast %16 : vector<1x256xf32> to vector<1x1x256xf32>
      %c0_15 = arith.constant 0 : index
      %c0_16 = arith.constant 0 : index
      %c0_17 = arith.constant 0 : index
      %18 = vector.load %arg6[%c0_15, %c0_16, %c0_17] : memref<1x1x256xf32, #tpu.memory_space<vmem>>, vector<1x1x256xf32>
      tpu.vector_store %arg6[%c0_15, %c0_16, %c0_17], %17 {strides = array<i32>} : memref<1x1x256xf32, #tpu.memory_space<vmem>>, vector<1x1x256xf32>,
      %19 = arith.mulf %12, %12 : vector<64x256xf32>
      %cst_18 = arith.constant dense<0.000000e+00> : vector<256xf32>
      %20 = vector.multi_reduction <add>, %19, %cst_18 [0] : vector<64x256xf32> to vector<256xf32>
      %21 = vector.shape_cast %20 : vector<256xf32> to vector<1x256xf32>
      %22 = vector.shape_cast %21 : vector<1x256xf32> to vector<1x1x256xf32>
      %c0_19 = arith.constant 0 : index
      %c0_20 = arith.constant 0 : index
      %c0_21 = arith.constant 0 : index
      %23 = vector.load %arg7[%c0_19, %c0_20, %c0_21] : memref<1x1x256xf32, #tpu.memory_space<vmem>>, vector<1x1x256xf32>
      tpu.vector_store %arg7[%c0_19, %c0_20, %c0_21], %22 {strides = array<i32>} : memref<1x1x256xf32, #tpu.memory_space<vmem>>, vector<1x1x256xf32>,
    } else {
    }
    return
  }
  func.func @transform_0(%arg0: i32, %arg1: i32, %arg2: i32) -> (i32, i32) {
    %c0_i32 = arith.constant 0 : i32
    return %arg0, %arg2 : i32, i32
  }
  func.func @transform_1(%arg0: i32, %arg1: i32, %arg2: i32) -> (i32, i32) {
    %c0_i32 = arith.constant 0 : i32
    return %arg2, %arg1 : i32, i32
  }
  func.func @transform_2(%arg0: i32, %arg1: i32, %arg2: i32) -> (i32, i32) {
    %c0_i32 = arith.constant 0 : i32
    return %arg0, %arg1 : i32, i32
  }
  func.func @transform_3(%arg0: i32, %arg1: i32, %arg2: i32) -> (i32, i32, i32) {
    %c0_i32 = arith.constant 0 : i32
    %c0_i32_0 = arith.constant 0 : i32
    return %arg0, %c0_i32, %arg1 : i32, i32, i32
  }
  func.func @transform_4(%arg0: i32, %arg1: i32, %arg2: i32) -> (i32, i32, i32) {
    %c0_i32 = arith.constant 0 : i32
    %c0_i32_0 = arith.constant 0 : i32
    return %arg0, %c0_i32, %arg1 : i32, i32, i32
  }
}

module attributes {stable_mosaic.version = 11 : i64} {
  func.func @kernel(%arg0: i32, %arg1: i32, %arg2: memref<64x256xbf16, #tpu.memory_space<vmem>>, %arg3: memref<1x256xf32, #tpu.memory_space<vmem>>, %arg4: memref<1x256xf32, #tpu.memory_space<vmem>>, %arg5: memref<64x256xbf16, #tpu.memory_space<vmem>>) attributes {dimension_semantics = [#tpu.dimension_semantics<parallel>, #tpu.dimension_semantics<parallel>], iteration_bounds = array<i64: 2, 1>, scalar_prefetch = 0 : i64, scratch_operands = 0 : i64, tpu.core_type = #tpu.core_type<tc>, window_params = [{transform_indices = @transform_0, window_bounds = array<i64: 64, 256>}, {transform_indices = @transform_1, window_bounds = array<i64: 1, 256>}, {transform_indices = @transform_2, window_bounds = array<i64: 1, 256>}, {transform_indices = @transform_3, window_bounds = array<i64: 64, 256>}]} {
    %c0 = arith.constant 0 : index
    %c0_0 = arith.constant 0 : index
    %0 = vector.load %arg2[%c0, %c0_0] : memref<64x256xbf16, #tpu.memory_space<vmem>>, vector<64x256xbf16>
    %1 = arith.extf %0 : vector<64x256xbf16> to vector<64x256xf32>
    %c0_1 = arith.constant 0 : index
    %c0_2 = arith.constant 0 : index
    %2 = vector.load %arg3[%c0_1, %c0_2] : memref<1x256xf32, #tpu.memory_space<vmem>>, vector<1x256xf32>
    %3 = vector.broadcast %2 : vector<1x256xf32> to vector<64x256xf32>
    %4 = arith.mulf %1, %3 : vector<64x256xf32>
    %c0_3 = arith.constant 0 : index
    %c0_4 = arith.constant 0 : index
    %5 = vector.load %arg4[%c0_3, %c0_4] : memref<1x256xf32, #tpu.memory_space<vmem>>, vector<1x256xf32>
    %6 = vector.broadcast %5 : vector<1x256xf32> to vector<64x256xf32>
    %7 = arith.addf %4, %6 : vector<64x256xf32>
    %cst = arith.constant 0.000000e+00 : f32
    %8 = vector.broadcast %cst : f32 to vector<64x256xf32>
    %9 = arith.maximumf %7, %8 : vector<64x256xf32>
    %10 = arith.truncf %9 : vector<64x256xf32> to vector<64x256xbf16>
    %c0_5 = arith.constant 0 : index
    %c0_6 = arith.constant 0 : index
    %11 = vector.load %arg5[%c0_5, %c0_6] : memref<64x256xbf16, #tpu.memory_space<vmem>>, vector<64x256xbf16>
    tpu.vector_store %arg5[%c0_5, %c0_6], %10 {strides = array<i32>} : memref<64x256xbf16, #tpu.memory_space<vmem>>, vector<64x256xbf16>,
    return
  }
  func.func @transform_0(%arg0: i32, %arg1: i32) -> (i32, i32) {
    %c0_i32 = arith.constant 0 : i32
    return %arg0, %arg1 : i32, i32
  }
  func.func @transform_1(%arg0: i32, %arg1: i32) -> (i32, i32) {
    %c0_i32 = arith.constant 0 : i32
    %c0_i32_0 = arith.constant 0 : i32
    return %c0_i32, %arg1 : i32, i32
  }
  func.func @transform_2(%arg0: i32, %arg1: i32) -> (i32, i32) {
    %c0_i32 = arith.constant 0 : i32
    %c0_i32_0 = arith.constant 0 : i32
    return %c0_i32, %arg1 : i32, i32
  }
  func.func @transform_3(%arg0: i32, %arg1: i32) -> (i32, i32) {
    %c0_i32 = arith.constant 0 : i32
    return %arg0, %arg1 : i32, i32
  }
}

module attributes {stable_mosaic.version = 11 : i64} {
  func.func @kernel(%arg0: i32, %arg1: i32, %arg2: memref<64x256xbf16, #tpu.memory_space<vmem>>, %arg3: memref<1x256xf32, #tpu.memory_space<vmem>>, %arg4: memref<1x256xf32, #tpu.memory_space<vmem>>, %arg5: memref<64x256xbf16, #tpu.memory_space<vmem>>, %arg6: memref<1x256xf32, #tpu.memory_space<vmem>>, %arg7: memref<1x256xf32, #tpu.memory_space<vmem>>, %arg8: memref<64x256xf32, #tpu.memory_space<vmem>>) attributes {dimension_semantics = [#tpu.dimension_semantics<parallel>, #tpu.dimension_semantics<parallel>], iteration_bounds = array<i64: 2, 1>, scalar_prefetch = 0 : i64, scratch_operands = 0 : i64, tpu.core_type = #tpu.core_type<tc>, window_params = [{transform_indices = @transform_0, window_bounds = array<i64: 64, 256>}, {transform_indices = @transform_1, window_bounds = array<i64: 1, 256>}, {transform_indices = @transform_2, window_bounds = array<i64: 1, 256>}, {transform_indices = @transform_3, window_bounds = array<i64: 64, 256>}, {transform_indices = @transform_4, window_bounds = array<i64: 1, 256>}, {transform_indices = @transform_5, window_bounds = array<i64: 1, 256>}, {transform_indices = @transform_6, window_bounds = array<i64: 64, 256>}]} {
    %c0 = arith.constant 0 : index
    %c0_0 = arith.constant 0 : index
    %0 = vector.load %arg2[%c0, %c0_0] : memref<64x256xbf16, #tpu.memory_space<vmem>>, vector<64x256xbf16>
    %1 = arith.extf %0 : vector<64x256xbf16> to vector<64x256xf32>
    %c0_1 = arith.constant 0 : index
    %c0_2 = arith.constant 0 : index
    %2 = vector.load %arg3[%c0_1, %c0_2] : memref<1x256xf32, #tpu.memory_space<vmem>>, vector<1x256xf32>
    %3 = vector.broadcast %2 : vector<1x256xf32> to vector<64x256xf32>
    %4 = arith.mulf %1, %3 : vector<64x256xf32>
    %c0_3 = arith.constant 0 : index
    %c0_4 = arith.constant 0 : index
    %5 = vector.load %arg4[%c0_3, %c0_4] : memref<1x256xf32, #tpu.memory_space<vmem>>, vector<1x256xf32>
    %6 = vector.broadcast %5 : vector<1x256xf32> to vector<64x256xf32>
    %7 = arith.addf %4, %6 : vector<64x256xf32>
    %c0_5 = arith.constant 0 : index
    %c0_6 = arith.constant 0 : index
    %8 = vector.load %arg5[%c0_5, %c0_6] : memref<64x256xbf16, #tpu.memory_space<vmem>>, vector<64x256xbf16>
    %9 = arith.extf %8 : vector<64x256xbf16> to vector<64x256xf32>
    %c0_7 = arith.constant 0 : index
    %c0_8 = arith.constant 0 : index
    %10 = vector.load %arg6[%c0_7, %c0_8] : memref<1x256xf32, #tpu.memory_space<vmem>>, vector<1x256xf32>
    %11 = vector.broadcast %10 : vector<1x256xf32> to vector<64x256xf32>
    %12 = arith.mulf %9, %11 : vector<64x256xf32>
    %c0_9 = arith.constant 0 : index
    %c0_10 = arith.constant 0 : index
    %13 = vector.load %arg7[%c0_9, %c0_10] : memref<1x256xf32, #tpu.memory_space<vmem>>, vector<1x256xf32>
    %14 = vector.broadcast %13 : vector<1x256xf32> to vector<64x256xf32>
    %15 = arith.addf %12, %14 : vector<64x256xf32>
    %16 = arith.addf %7, %15 : vector<64x256xf32>
    %cst = arith.constant 0.000000e+00 : f32
    %17 = vector.broadcast %cst : f32 to vector<64x256xf32>
    %18 = arith.maximumf %16, %17 : vector<64x256xf32>
    %c0_11 = arith.constant 0 : index
    %c0_12 = arith.constant 0 : index
    %19 = vector.load %arg8[%c0_11, %c0_12] : memref<64x256xf32, #tpu.memory_space<vmem>>, vector<64x256xf32>
    tpu.vector_store %arg8[%c0_11, %c0_12], %18 {strides = array<i32>} : memref<64x256xf32, #tpu.memory_space<vmem>>, vector<64x256xf32>,
    return
  }
  func.func @transform_0(%arg0: i32, %arg1: i32) -> (i32, i32) {
    %c0_i32 = arith.constant 0 : i32
    return %arg0, %arg1 : i32, i32
  }
  func.func @transform_1(%arg0: i32, %arg1: i32) -> (i32, i32) {
    %c0_i32 = arith.constant 0 : i32
    %c0_i32_0 = arith.constant 0 : i32
    return %c0_i32, %arg1 : i32, i32
  }
  func.func @transform_2(%arg0: i32, %arg1: i32) -> (i32, i32) {
    %c0_i32 = arith.constant 0 : i32
    %c0_i32_0 = arith.constant 0 : i32
    return %c0_i32, %arg1 : i32, i32
  }
  func.func @transform_3(%arg0: i32, %arg1: i32) -> (i32, i32) {
    %c0_i32 = arith.constant 0 : i32
    return %arg0, %arg1 : i32, i32
  }
  func.func @transform_4(%arg0: i32, %arg1: i32) -> (i32, i32) {
    %c0_i32 = arith.constant 0 : i32
    %c0_i32_0 = arith.constant 0 : i32
    return %c0_i32, %arg1 : i32, i32
  }
  func.func @transform_5(%arg0: i32, %arg1: i32) -> (i32, i32) {
    %c0_i32 = arith.constant 0 : i32
    %c0_i32_0 = arith.constant 0 : i32
    return %c0_i32, %arg1 : i32, i32
  }
  func.func @transform_6(%arg0: i32, %arg1: i32) -> (i32, i32) {
    %c0_i32 = arith.constant 0 : i32
    return %arg0, %arg1 : i32, i32
  }
}

</mosaic_0001>

<bundles_post_ra>
// kernel: basic_block_forward.6
= control target key start
LH: loop header
LB: loop body
LE: loop exit
PB: predicated region body
PF: predicated region fallthrough
CT: control target
= control target key end

     0   :  { %s623_s12 = smov 0   ;;  %s625_s13 = smov 0   ;;  %s729_s0 = inlined_call_operand.vmem [shape: bf16[128,256], index: 0, kind: input, shape index: {}]   ;;  %s730_s1 = inlined_call_operand.vmem [shape: f32[1,256], index: 1, kind: input, shape index: {}]   ;;  %s731_s2 = inlined_call_operand.vmem [shape: f32[1,256], index: 2, kind: input, shape index: {}]   ;;  %s732_s3 = inlined_call_operand.vmem [shape: bf16[128,256], index: 3, kind: output, shape index: {}]  }
   0x1   :  { %s627_s14 = smov 0  }
   0x2 LB: > { %s25_s15 = sadd.s32 1, %s597_s13  ;;  %p528_p0 = scmp.ge.s32.totalorder %s601_s14, 1  ;;  %s601_s14 = sphi %s627_s14, %s13_s14   ;;  %s597_s13 = sphi %s625_s13, %s734_s13   ;;  %s593_s12 = sphi %s623_s12, %s733_s12  }
   0x3   : > { %p27_p1 = scmp.ge.s32.totalorder %s25_s15, 2  ;;  %p180_p2 = scmp.lt.s32.totalorder %s601_s14, 3 }
   0x5   : > { %s736_s15 = smov (%p27_p1, %s25_s15), 0  ;;  %p181_p3 = pnand %p528_p0, %p180_p2 }
   0x6   : > { %s529_s16 = sshll.u32 (!%p181_p3), %s593_s12, 3 }
   0x7   : > { %184 = sbr.rel (%p181_p3) target bundleno = 40 (0x28), region = 32  ;;  %p224_p4 = scmp.lt.s32.totalorder (!%p181_p3), %s529_s16, 15 }
   0xc   : > { %v282_v0 = vlaneseq  ;;  %s738_s16 = smov (!%p224_p4, %s529_s16), 15  ;;  %v280_v2 = vld [vmem:[%s730_s1] sm:$0x3] }
   0xd   : > { %v308_v5 = vld [vmem:[%s731_s2] sm:$0x3]  ;;  %s545_s21 = sshll.u32 %s738_s16, 3 }
   0xe   : > { %v283_v1 = vshrl.u32 %v282_v0, 7  ;;  %s655_s24 = scalar_lea.vmem %s729_s0, %s545_s21  ;;  %s692_s27 = scalar_lea.vmem %s732_s3, %s545_s21 }
   0xf   : > { %v256_v8 = vld [vmem:[%s655_s24] sm:$0xff]  ;;  %v257_v11 = vld [vmem:[%s655_s24 + $0x8] sm:$0xff]  ;;  %v258_v12 = vld [vmem:[%s655_s24 + $0x10] sm:$0xff] }
  0x10   : > { %v284_v3 = vsub.s32 0, %v283_v1  ;;  %v288_v4 = vsub.s32 1, %v283_v1  ;;  %v264_v13 = vunpack.c.l.bf16 %v256_v8  ;;  %v265_v14 = vunpack.c.h.bf16 %v256_v8  ;;  %v259_v17 = vld [vmem:[%s655_s24 + $0x18] sm:$0xff]  ;;  %v260_v38 = vld [vmem:[%s655_s24 + $0x20] sm:$0xff]  ;;  %v261_v43 = vld [vmem:[%s655_s24 + $0x28] sm:$0xff] }
  0x11   : > { %v266_v15 = vunpack.c.l.bf16 %v257_v11  ;;  %v267_v16 = vunpack.c.h.bf16 %v257_v11  ;;  %v268_v18 = vunpack.c.l.bf16 %v258_v12  ;;  %v269_v19 = vunpack.c.h.bf16 %v258_v12  ;;  %v262_v48 = vld [vmem:[%s655_s24 + $0x30] sm:$0xff]  ;;  %v263_v53 = vld [vmem:[%s655_s24 + $0x38] sm:$0xff] }
  0x12   : > { %v657_v6 = vrot.slane %v280_v2, %v284_v3  ;;  %v659_v7 = vrot.slane %v280_v2, %v288_v4  ;;  %v662_v9 = vrot.slane %v308_v5, %v284_v3  ;;  %v664_v10 = vrot.slane %v308_v5, %v288_v4 }
  0x13   : > { %v270_v20 = vunpack.c.l.bf16 %v259_v17  ;;  %v271_v21 = vunpack.c.h.bf16 %v259_v17  ;;  %v272_v51 = vunpack.c.l.bf16 %v260_v38  ;;  %v273_v52 = vunpack.c.h.bf16 %v260_v38 }
  0x14   : > { %v292_v22 = vmul.f32 %v657_v6, %v264_v13  ;;  %v293_v23 = vmul.f32 %v659_v7, %v265_v14  ;;  %v294_v24 = vmul.f32 %v657_v6, %v266_v15  ;;  %v295_v25 = vmul.f32 %v659_v7, %v267_v16 }
  0x15   : > { %v296_v26 = vmul.f32 %v657_v6, %v268_v18  ;;  %v297_v27 = vmul.f32 %v659_v7, %v269_v19  ;;  %v298_v28 = vmul.f32 %v657_v6, %v270_v20  ;;  %v299_v29 = vmul.f32 %v659_v7, %v271_v21 }
  0x16   : > { %v320_v30 = vadd.f32 %v662_v9, %v292_v22  ;;  %v321_v31 = vadd.f32 %v664_v10, %v293_v23  ;;  %v322_v32 = vadd.f32 %v662_v9, %v294_v24  ;;  %v323_v33 = vadd.f32 %v664_v10, %v295_v25 }
  0x17   : > { %v324_v34 = vadd.f32 %v662_v9, %v296_v26  ;;  %v325_v35 = vadd.f32 %v664_v10, %v297_v27  ;;  %v326_v36 = vadd.f32 %v662_v9, %v298_v28  ;;  %v327_v37 = vadd.f32 %v664_v10, %v299_v29 }
  0x18   : > { %v336_v39 = vmax.f32 %v320_v30, 0.0  ;;  %v337_v40 = vmax.f32 %v321_v31, 0.0  ;;  %v338_v41 = vmax.f32 %v322_v32, 0.0  ;;  %v339_v42 = vmax.f32 %v323_v33, 0.0 }
  0x19   : > { %v340_v44 = vmax.f32 %v324_v34, 0.0  ;;  %v341_v45 = vmax.f32 %v325_v35, 0.0  ;;  %v342_v46 = vmax.f32 %v326_v36, 0.0  ;;  %v343_v47 = vmax.f32 %v327_v37, 0.0 }
  0x1a   : > { %v547_v49 = vpack.c.bf16 %v337_v40, %v336_v39  ;;  %v548_v50 = vpack.c.bf16 %v339_v42, %v338_v41  ;;  %v274_v56 = vunpack.c.l.bf16 %v261_v43  ;;  %v275_v57 = vunpack.c.h.bf16 %v261_v43 }
  0x1b   : > { %v549_v54 = vpack.c.bf16 %v341_v45, %v340_v44  ;;  %v550_v55 = vpack.c.bf16 %v343_v47, %v342_v46  ;;  %v300_v58 = vmul.f32 %v657_v6, %v272_v51  ;;  %v301_v59 = vmul.f32 %v659_v7, %v273_v52 }
  0x1c   : > { %400 = vst [vmem:[%s692_s27] sm:$0xff] %v547_v49  ;;  %401 = vst [vmem:[%s692_s27 + $0x8] sm:$0xff] %v548_v50  ;;  %v276_v60 = vunpack.c.l.bf16 %v262_v48  ;;  %v277_v61 = vunpack.c.h.bf16 %v262_v48  ;;  %v302_v62 = vmul.f32 %v657_v6, %v274_v56  ;;  %v303_v63 = vmul.f32 %v659_v7, %v275_v57 }
  0x1d   : > { %402 = vst [vmem:[%s692_s27 + $0x10] sm:$0xff] %v549_v54  ;;  %403 = vst [vmem:[%s692_s27 + $0x18] sm:$0xff] %v550_v55  ;;  %v278_v0 = vunpack.c.l.bf16 %v263_v53  ;;  %v279_v1 = vunpack.c.h.bf16 %v263_v53  ;;  %v328_v2 = vadd.f32 %v662_v9, %v300_v58  ;;  %v329_v3 = vadd.f32 %v664_v10, %v301_v59 }
  0x1e   : > { %v304_v4 = vmul.f32 %v657_v6, %v276_v60  ;;  %v305_v5 = vmul.f32 %v659_v7, %v277_v61  ;;  %v330_v8 = vadd.f32 %v662_v9, %v302_v62  ;;  %v331_v11 = vadd.f32 %v664_v10, %v303_v63 }
  0x1f   : > { %v306_v12 = vmul.f32 %v657_v6, %v278_v0  ;;  %v307_v13 = vmul.f32 %v659_v7, %v279_v1  ;;  %v344_v14 = vmax.f32 %v328_v2, 0.0  ;;  %v345_v15 = vmax.f32 %v329_v3, 0.0 }
  0x20   : > { %v332_v16 = vadd.f32 %v662_v9, %v304_v4  ;;  %v333_v17 = vadd.f32 %v664_v10, %v305_v5  ;;  %v346_v18 = vmax.f32 %v330_v8, 0.0  ;;  %v347_v19 = vmax.f32 %v331_v11, 0.0 }
  0x21   : > { %v334_v20 = vadd.f32 %v662_v9, %v306_v12  ;;  %v335_v21 = vadd.f32 %v664_v10, %v307_v13  ;;  %v551_v22 = vpack.c.bf16 %v345_v15, %v344_v14 }
  0x22   : > { %v348_v6 = vmax.f32 %v332_v16, 0.0  ;;  %v349_v23 = vmax.f32 %v333_v17, 0.0  ;;  %v552_v24 = vpack.c.bf16 %v347_v19, %v346_v18 }
  0x23   : > { %v350_v7 = vmax.f32 %v334_v20, 0.0  ;;  %v351_v25 = vmax.f32 %v335_v21, 0.0  ;;  %404 = vst [vmem:[%s692_s27 + $0x20] sm:$0xff] %v551_v22 }
  0x24   : > { %v553_v26 = vpack.c.bf16 %v349_v23, %v348_v6  ;;  %405 = vst [vmem:[%s692_s27 + $0x28] sm:$0xff] %v552_v24 }
  0x25   : > { %v554_v27 = vpack.c.bf16 %v351_v25, %v350_v7 }
  0x26   : > { %406 = vst [vmem:[%s692_s27 + $0x30] sm:$0xff] %v553_v26 }
  0x27   : > { %407 = vst [vmem:[%s692_s27 + $0x38] sm:$0xff] %v554_v27 }
  0x28 PF: > { %s13_s14 = sadd.s32 1, %s601_s14   ;;  %s733_s12 = smov %s597_s13 }
  0x29   : > { %p10_p5 = scmp.ge.s32.totalorder %s13_s14, 4   ;;  %s734_s13 = smov %s736_s15 }
  0x2b   :  { %12 = sbr.rel (!%p10_p5) target bundleno = 2 (0x2), region = 68 }

// kernel: basic_block_forward.5
= control target key start
LH: loop header
LB: loop body
LE: loop exit
PB: predicated region body
PF: predicated region fallthrough
CT: control target
= control target key end

     0   :  { %s1345_s15 = smov 0   ;;  %s1347_s16 = smov 0   ;;  %s1512_s0 = inlined_call_operand.vmem [shape: bf16[128,256], index: 0, kind: input, shape index: {}]   ;;  %s1513_s1 = inlined_call_operand.vmem [shape: bf16[256,256], index: 1, kind: input, shape index: {}]   ;;  %s1514_s2 = inlined_call_operand.vmem [shape: bf16[128,256], index: 2, kind: output, shape index: {0}]   ;;  %s1515_s3 = inlined_call_operand.vmem [shape: f32[2,1,256], index: 3, kind: output, shape index: {1}]   ;;  %s1516_s4 = inlined_call_operand.vmem [shape: f32[2,1,256], index: 4, kind: output, shape index: {2}]  }
   0x1   :  { %s1349_s17 = smov 0  }
   0x2 LB: > { %s34_s18 = sadd.s32 1, %s1313_s16  ;;  %p1109_p0 = scmp.ge.s32.totalorder %s1317_s17, 1  ;;  %s1317_s17 = sphi %s1349_s17, %s15_s17   ;;  %s1313_s16 = sphi %s1347_s16, %s1518_s16   ;;  %s1309_s15 = sphi %s1345_s15, %s1517_s15  }
   0x3   : > { %p36_p1 = scmp.ge.s32.totalorder %s34_s18, 2  ;;  %p220_p2 = scmp.lt.s32.totalorder %s1317_s17, 3 }
   0x5   : > { %s1520_s18 = smov (%p36_p1, %s34_s18), 0  ;;  %p221_p3 = pnand %p1109_p0, %p220_p2 }
   0x6   : > { %s1110_s29 = sshll.u32 (!%p221_p3), %s1309_s15, 3  ;;  %p319_p5 = scmp.lt.s32.totalorder (!%p221_p3), %s1309_s15, 1 }
   0x7   : > { %224 = sbr.rel (%p221_p3) target bundleno = 316 (0x13c), region = 28  ;;  %p284_p4 = scmp.lt.s32.totalorder (!%p221_p3), %s1110_s29, 15 }
   0xc   : > { %v1235_v0 = vld [vmem:[%s1513_s1 + $0x74] ss:$8 sps:$4 sm:$0xff]   ;;  %v1237_v1 = vld [vmem:[%s1513_s1 + $0x70] ss:$8 sps:$4 sm:$0xff]   ;;  %v1238_v2 = vld [vmem:[%s1513_s1 + $0x64] ss:$8 sps:$4 sm:$0xff]  }
   0xd   : > { %612 = vmatprep.subr.bf16.mxu0 %v1235_v0  ;;  %1178 = vmatprep.subr.bf16.mxu1 %v1235_v0  ;;  %v1240_v3 = vld [vmem:[%s1513_s1 + $0x60] ss:$8 sps:$4 sm:$0xff]   ;;  %v1241_v4 = vld [vmem:[%s1513_s1 + $0x54] ss:$8 sps:$4 sm:$0xff]   ;;  %v1243_v5 = vld [vmem:[%s1513_s1 + $0x50] ss:$8 sps:$4 sm:$0xff]  }
   0xe   : > { %613 = vmatpush1.bf16.msra.mxu0 %v1237_v1  ;;  %1194 = vmatpush1.bf16.msra.mxu1 %v1237_v1  ;;  %v1244_v6 = vld [vmem:[%s1513_s1 + $0x44] ss:$8 sps:$4 sm:$0xff]   ;;  %v1246_v7 = vld [vmem:[%s1513_s1 + $0x40] ss:$8 sps:$4 sm:$0xff]   ;;  %v1247_v8 = vld [vmem:[%s1513_s1 + $0x34] ss:$8 sps:$4 sm:$0xff]  }
   0xf   : > { %614 = vmatprep.subr.bf16.mxu0 %v1238_v2  ;;  %1179 = vmatprep.subr.bf16.mxu1 %v1238_v2  ;;  %s1522_s29 = smov (!%p284_p4, %s1110_s29), 15  ;;  %v1249_v9 = vld [vmem:[%s1513_s1 + $0x30] ss:$8 sps:$4 sm:$0xff]   ;;  %v1250_v10 = vld [vmem:[%s1513_s1 + $0x24] ss:$8 sps:$4 sm:$0xff]   ;;  %s1524_s15 = smov (!%p319_p5, %s1309_s15), 1 }
  0x10   : > { %s1168_s20 = sshll.u32 %s1522_s29, 3  ;;  %v1252_v11 = vld [vmem:[%s1513_s1 + $0x20] ss:$8 sps:$4 sm:$0xff]   ;;  %v1253_v12 = vld [vmem:[%s1513_s1 + $0x14] ss:$8 sps:$4 sm:$0xff]   ;;  %s1116_s29 = sshll.u32 %s1524_s15, 1 }
  0x11   : > { %s1410_s25 = scalar_lea.vmem %s1512_s0, %s1168_s20  ;;  %v1255_v14 = vld [vmem:[%s1513_s1 + $0x10] ss:$8 sps:$4 sm:$0xff]   ;;  %v1256_v16 = vld [vmem:[%s1513_s1 + $0x4] ss:$8 sps:$4 sm:$0xff]   ;;  %v1258_v17 = vld [vmem:[%s1513_s1] ss:$8 sps:$4 sm:$0xff]   ;;  %s1485_s5 = scalar_lea.vmem %s1514_s2, %s1168_s20 }
  0x12   : > { %615 = vmatpush1.bf16.msra.mxu0 %v1240_v3  ;;  %1195 = vmatpush1.bf16.msra.mxu1 %v1240_v3  ;;  %v1285_v13 = vld [vmem:[%s1410_s25 + $0x4] ss:$8 sps:$4 sm:$0xff]   ;;  %v1259_v18 = vld [vmem:[%s1513_s1 + $0xf4] ss:$8 sps:$4 sm:$0xff]   ;;  %v1261_v19 = vld [vmem:[%s1513_s1 + $0xf0] ss:$8 sps:$4 sm:$0xff]   ;;  %s325_s6 = scalar_lea.vmem %s1515_s3, %s1116_s29  ;;  %s334_s9 = scalar_lea.vmem %s1516_s4, %s1116_s29 }
  0x13   : > { %616 = vmatprep.subr.bf16.mxu0 %v1241_v4  ;;  %1180 = vmatprep.subr.bf16.mxu1 %v1241_v4  ;;  %v1288_v15 = vld [vmem:[%s1410_s25 + $0x24] ss:$8 sps:$4 sm:$0xff]   ;;  %v1264_v21 = vld [vmem:[%s1513_s1 + $0xe0] ss:$8 sps:$4 sm:$0xff]   ;;  %v1265_v22 = vld [vmem:[%s1513_s1 + $0xd4] ss:$8 sps:$4 sm:$0xff]  }
  0x14   : > { %644 = vmatprep.mubr.bf16.mxu0 %v1285_v13  ;;  %664 = vmatprep.mubr.bf16.mxu1 %v1288_v15  ;;  %v1262_v20 = vld [vmem:[%s1513_s1 + $0xe4] ss:$8 sps:$4 sm:$0xff]   ;;  %v1267_v23 = vld [vmem:[%s1513_s1 + $0xd0] ss:$8 sps:$4 sm:$0xff]   ;;  %v1270_v25 = vld [vmem:[%s1513_s1 + $0xc0] ss:$8 sps:$4 sm:$0xff]  }
  0x15   : > { %v1268_v24 = vld [vmem:[%s1513_s1 + $0xc4] ss:$8 sps:$4 sm:$0xff]   ;;  %v1271_v26 = vld [vmem:[%s1513_s1 + $0xb4] ss:$8 sps:$4 sm:$0xff]   ;;  %v1273_v27 = vld [vmem:[%s1513_s1 + $0xb0] ss:$8 sps:$4 sm:$0xff]  }
  0x16   : > { %617 = vmatpush1.bf16.msra.mxu0 %v1243_v5  ;;  %1196 = vmatpush1.bf16.msra.mxu1 %v1243_v5  ;;  %v1274_v28 = vld [vmem:[%s1513_s1 + $0xa4] ss:$8 sps:$4 sm:$0xff]   ;;  %v1276_v29 = vld [vmem:[%s1513_s1 + $0xa0] ss:$8 sps:$4 sm:$0xff]   ;;  %v1277_v30 = vld [vmem:[%s1513_s1 + $0x94] ss:$8 sps:$4 sm:$0xff]  }
  0x17   : > { %618 = vmatprep.subr.bf16.mxu0 %v1244_v6  ;;  %1181 = vmatprep.subr.bf16.mxu1 %v1244_v6  ;;  %v1279_v31 = vld [vmem:[%s1513_s1 + $0x90] ss:$8 sps:$4 sm:$0xff]   ;;  %v1280_v32 = vld [vmem:[%s1513_s1 + $0x84] ss:$8 sps:$4 sm:$0xff]   ;;  %v1282_v33 = vld [vmem:[%s1513_s1 + $0x80] ss:$8 sps:$4 sm:$0xff]  }
  0x18   : > { %v1283_v34 = vld [vmem:[%s1410_s25] ss:$8 sps:$4 sm:$0xff]   ;;  %v1289_v36 = vld [vmem:[%s1410_s25 + $0x14] ss:$8 sps:$4 sm:$0xff]   ;;  %v1291_v38 = vld [vmem:[%s1410_s25 + $0x10] ss:$8 sps:$4 sm:$0xff]  }
  0x19   : > { %v1286_v35 = vld [vmem:[%s1410_s25 + $0x20] ss:$8 sps:$4 sm:$0xff]   ;;  %v1292_v37 = vld [vmem:[%s1410_s25 + $0x34] ss:$8 sps:$4 sm:$0xff]   ;;  %v1294_v39 = vld [vmem:[%s1410_s25 + $0x30] ss:$8 sps:$4 sm:$0xff]  }
  0x1a   : > { %619 = vmatpush1.bf16.msra.mxu0 %v1246_v7  ;;  %1197 = vmatpush1.bf16.msra.mxu1 %v1246_v7 }
  0x1b   : > { %620 = vmatprep.subr.bf16.mxu0 %v1247_v8  ;;  %1182 = vmatprep.subr.bf16.mxu1 %v1247_v8 }
  0x1e   : > { %621 = vmatpush1.bf16.msra.mxu0 %v1249_v9  ;;  %1198 = vmatpush1.bf16.msra.mxu1 %v1249_v9 }
  0x1f   : > { %622 = vmatprep.subr.bf16.mxu0 %v1250_v10  ;;  %1183 = vmatprep.subr.bf16.mxu1 %v1250_v10 }
  0x22   : > { %623 = vmatpush1.bf16.msra.mxu0 %v1252_v11  ;;  %1199 = vmatpush1.bf16.msra.mxu1 %v1252_v11 }
  0x23   : > { %624 = vmatprep.subr.bf16.mxu0 %v1253_v12  ;;  %1184 = vmatprep.subr.bf16.mxu1 %v1253_v12 }
  0x26   : > { %625 = vmatpush1.bf16.msra.mxu0 %v1255_v14  ;;  %1200 = vmatpush1.bf16.msra.mxu1 %v1255_v14 }
  0x27   : > { %626 = vmatprep.subr.bf16.mxu0 %v1256_v16  ;;  %1185 = vmatprep.subr.bf16.mxu1 %v1256_v16 }
  0x2a   : > { %627 = vmatpush1.bf16.msra.mxu0 %v1258_v17  ;;  %1201 = vmatpush1.bf16.msra.mxu1 %v1258_v17 }
  0x2b   : > { %628 = vmatprep.subr.bf16.mxu0 %v1259_v18  ;;  %1186 = vmatprep.subr.bf16.mxu1 %v1259_v18 }
  0x2e   : > { %629 = vmatpush2.bf16.msra.mxu0 %v1261_v19  ;;  %1202 = vmatpush2.bf16.msra.mxu1 %v1261_v19 }
  0x2f   : > { %630 = vmatprep.subr.bf16.mxu0 %v1262_v20  ;;  %1187 = vmatprep.subr.bf16.mxu1 %v1262_v20 }
  0x32   : > { %631 = vmatpush2.bf16.msra.mxu0 %v1264_v21  ;;  %1203 = vmatpush2.bf16.msra.mxu1 %v1264_v21 }
  0x33   : > { %632 = vmatprep.subr.bf16.mxu0 %v1265_v22  ;;  %1188 = vmatprep.subr.bf16.mxu1 %v1265_v22 }
  0x36   : > { %633 = vmatpush2.bf16.msra.mxu0 %v1267_v23  ;;  %1204 = vmatpush2.bf16.msra.mxu1 %v1267_v23 }
  0x37   : > { %634 = vmatprep.subr.bf16.mxu0 %v1268_v24  ;;  %1189 = vmatprep.subr.bf16.mxu1 %v1268_v24 }
  0x3a   : > { %635 = vmatpush2.bf16.msra.mxu0 %v1270_v25  ;;  %1205 = vmatpush2.bf16.msra.mxu1 %v1270_v25 }
  0x3b   : > { %636 = vmatprep.subr.bf16.mxu0 %v1271_v26  ;;  %1190 = vmatprep.subr.bf16.mxu1 %v1271_v26 }
  0x3e   : > { %637 = vmatpush2.bf16.msra.mxu0 %v1273_v27  ;;  %1206 = vmatpush2.bf16.msra.mxu1 %v1273_v27 }
  0x3f   : > { %638 = vmatprep.subr.bf16.mxu0 %v1274_v28  ;;  %1191 = vmatprep.subr.bf16.mxu1 %v1274_v28 }
  0x42   : > { %639 = vmatpush2.bf16.msra.mxu0 %v1276_v29  ;;  %1207 = vmatpush2.bf16.msra.mxu1 %v1276_v29 }
  0x43   : > { %640 = vmatprep.subr.bf16.mxu0 %v1277_v30  ;;  %1192 = vmatprep.subr.bf16.mxu1 %v1277_v30 }
  0x46   : > { %641 = vmatpush2.bf16.msra.mxu0 %v1279_v31  ;;  %1208 = vmatpush2.bf16.msra.mxu1 %v1279_v31 }
  0x47   : > { %642 = vmatprep.subr.bf16.mxu0 %v1280_v32  ;;  %1193 = vmatprep.subr.bf16.mxu1 %v1280_v32 }
  0x4a   : > { %643 = vmatpush2.bf16.msra.mxu0 %v1282_v33  ;;  %1209 = vmatpush2.bf16.msra.mxu1 %v1282_v33 }
  0x4d   : > { %645 = vmatmul.mubr.bf16.vlgmr.msra.gmra.mxu0 %v1283_v34  ;;  %665 = vmatmul.mubr.bf16.vlgmr.msra.gmra.mxu1 %v1286_v35 }
  0x4e   : > { %654 = vmatprep.mubr.bf16.mxu0 %v1289_v36  ;;  %674 = vmatprep.mubr.bf16.mxu1 %v1292_v37 }
  0x55   : > { %655 = vmatmul.mubr.bf16.gmra.mxu0 %v1291_v38  ;;  %675 = vmatmul.mubr.bf16.gmra.mxu1 %v1294_v39 }
 0x10d   : > { %v646_v40 = vpop.f32.mrf.mxu0  ;;  %v666_v41 = vpop.f32.mrf.mxu1 }
 0x10e   : > { %v841_v55 = vmul.f32 %v646_v40, %v646_v40  ;;  %v849_v10 = vmul.f32 %v666_v41, %v666_v41 }
 0x10f   : > { %v648_v42 = vpop.f32.mrf.mxu0  ;;  %v668_v43 = vpop.f32.mrf.mxu1 }
 0x110   : > { %v1170_v44 = vpack.c.bf16 %v648_v42, %v646_v40  ;;  %v1174_v45 = vpack.c.bf16 %v668_v43, %v666_v41  ;;  %v842_v1 = vmul.f32 %v648_v42, %v648_v42  ;;  %v850_v25 = vmul.f32 %v668_v43, %v668_v43 }
 0x111   : > { %v650_v46 = vpop.f32.mrf.mxu0  ;;  %v670_v47 = vpop.f32.mrf.mxu1 }
 0x112   : > { %784 = vst [vmem:[%s1485_s5] sm:$0xff] %v1170_v44  ;;  %788 = vst [vmem:[%s1485_s5 + $0x20] sm:$0xff] %v1174_v45  ;;  %v843_v50 = vmul.f32 %v650_v46, %v650_v46  ;;  %v792_v56 = vadd.f32 %v650_v46, %v646_v40  ;;  %v851_v21 = vmul.f32 %v670_v47, %v670_v47 }
 0x113   : > { %v652_v48 = vpop.f32.mrf.mxu0  ;;  %v672_v49 = vpop.f32.mrf.mxu1 }
 0x114   : > { %v1171_v51 = vpack.c.bf16 %v652_v48, %v650_v46  ;;  %v1175_v53 = vpack.c.bf16 %v672_v49, %v670_v47  ;;  %v844_v58 = vmul.f32 %v652_v48, %v652_v48  ;;  %v857_v61 = vadd.f32 %v843_v50, %v841_v55 }
 0x115   : > { %v656_v52 = vpop.f32.mrf.mxu0  ;;  %v676_v54 = vpop.f32.mrf.mxu1  ;;  %v805_v62 = vadd.f32 %v652_v48, %v648_v42  ;;  %v852_v31 = vmul.f32 %v672_v49, %v672_v49 }
 0x116   : > { %785 = vst [vmem:[%s1485_s5 + $0x8] sm:$0xff] %v1171_v51  ;;  %v845_v57 = vmul.f32 %v656_v52, %v656_v52  ;;  %789 = vst [vmem:[%s1485_s5 + $0x28] sm:$0xff] %v1175_v53  ;;  %v793_v63 = vadd.f32 %v792_v56, %v656_v52  ;;  %v870_v11 = vadd.f32 %v844_v58, %v842_v1  ;;  %v824_v53 = vlaneseq }
 0x117   : > { %v658_v59 = vpop.f32.mrf.mxu0  ;;  %v678_v60 = vpop.f32.mrf.mxu1  ;;  %v853_v27 = vmul.f32 %v676_v54, %v676_v54 }
 0x118   : > { %v1172_v0 = vpack.c.bf16 %v658_v59, %v656_v52  ;;  %v846_v2 = vmul.f32 %v658_v59, %v658_v59  ;;  %v1176_v4 = vpack.c.bf16 %v678_v60, %v676_v54  ;;  %v858_v6 = vadd.f32 %v857_v61, %v845_v57 }
 0x119   : > { %v660_v3 = vpop.f32.mrf.mxu0  ;;  %v680_v5 = vpop.f32.mrf.mxu1  ;;  %v806_v7 = vadd.f32 %v805_v62, %v658_v59  ;;  %v854_v37 = vmul.f32 %v678_v60, %v678_v60  ;;  %vm838_vm0 = vcmp.lt.s32.totalorder %v824_v53, 256 }
 0x11a   : > { %786 = vst [vmem:[%s1485_s5 + $0x10] sm:$0xff] %v1172_v0  ;;  %v794_v8 = vadd.f32 %v793_v63, %v660_v3  ;;  %v847_v9 = vmul.f32 %v660_v3, %v660_v3  ;;  %790 = vst [vmem:[%s1485_s5 + $0x30] sm:$0xff] %v1176_v4  ;;  %v871_v18 = vadd.f32 %v870_v11, %v846_v2  ;;  %v825_v63 = vshrl.u32 %v824_v53, 7 }
 0x11b   : > { %v662_v12 = vpop.f32.mrf.mxu0  ;;  %v682_v13 = vpop.f32.mrf.mxu1  ;;  %v855_v34 = vmul.f32 %v680_v5, %v680_v5 }
 0x11c   : > { %v795_v14 = vadd.f32 %v794_v8, %v666_v41  ;;  %v859_v15 = vadd.f32 %v858_v6, %v847_v9  ;;  %v1173_v16 = vpack.c.bf16 %v662_v12, %v660_v3  ;;  %v807_v17 = vadd.f32 %v806_v7, %v662_v12 }
 0x11d   : > { %v848_v19 = vmul.f32 %v662_v12, %v662_v12  ;;  %v1177_v20 = vpack.c.bf16 %v682_v13, %v680_v5  ;;  %v856_v42 = vmul.f32 %v682_v13, %v682_v13 }
 0x11e   : > { %v860_v22 = vadd.f32 %v859_v15, %v849_v10  ;;  %787 = vst [vmem:[%s1485_s5 + $0x18] sm:$0xff] %v1173_v16  ;;  %v808_v23 = vadd.f32 %v807_v17, %v668_v43  ;;  %v796_v24 = vadd.f32 %v795_v14, %v670_v47  ;;  %v1319_v47 = vmov 1966171168  }
 0x11f   : > { %v872_v26 = vadd.f32 %v871_v18, %v848_v19  ;;  %791 = vst [vmem:[%s1485_s5 + $0x38] sm:$0xff] %v1177_v20  ;;  %v822_v48 = vunpack.c.l.s4 %v1319_v47 }
 0x120   : > { %v797_v28 = vadd.f32 %v796_v24, %v676_v54  ;;  %v861_v29 = vadd.f32 %v860_v22, %v851_v21  ;;  %v809_v30 = vadd.f32 %v808_v23, %v672_v49 }
 0x121   : > { %v873_v32 = vadd.f32 %v872_v26, %v850_v25  ;;  %v823_v58 = vunpack.c.0.s8 %v822_v48 }
 0x122   : > { %v798_v33 = vadd.f32 %v797_v28, %v680_v5  ;;  %v862_v35 = vadd.f32 %v861_v29, %v853_v27  ;;  %v810_v36 = vadd.f32 %v809_v30, %v678_v60 }
 0x123   : > { %v874_v38 = vadd.f32 %v873_v32, %v852_v31  ;;  %v826_v6 = vsub.s32 %v823_v58, %v825_v63 }
 0x124   : > { %v799_v39 = vrot.slane %v798_v33, 4  ;;  %v863_v40 = vadd.f32 %v862_v35, %v855_v34  ;;  %v811_v41 = vadd.f32 %v810_v36, %v682_v13 }
 0x125   : > { %v875_v43 = vadd.f32 %v874_v38, %v854_v37 }
 0x126   : > { %v800_v44 = vadd.f32 %v799_v39, %v798_v33  ;;  %v864_v45 = vrot.slane %v863_v40, 4  ;;  %v812_v46 = vrot.slane %v811_v41, 4 }
 0x127   : > { %v876_v50 = vadd.f32 %v875_v43, %v856_v42 }
 0x128   : > { %v801_v49 = vrot.slane %v800_v44, 2  ;;  %v865_v51 = vadd.f32 %v864_v45, %v863_v40  ;;  %v813_v52 = vadd.f32 %v812_v46, %v811_v41 }
 0x129   : > { %v877_v54 = vrot.slane %v876_v50, 4 }
 0x12a   : > { %v802_v55 = vadd.f32 %v801_v49, %v800_v44  ;;  %v866_v56 = vrot.slane %v865_v51, 2  ;;  %v814_v57 = vrot.slane %v813_v52, 2 }
 0x12b   : > { %v878_v59 = vadd.f32 %v877_v54, %v876_v50 }
 0x12c   : > { %v803_v60 = vrot.slane %v802_v55, 1  ;;  %v867_v61 = vadd.f32 %v866_v56, %v865_v51  ;;  %v815_v62 = vadd.f32 %v814_v57, %v813_v52 }
 0x12d   : > { %v879_v0 = vrot.slane %v878_v59, 2 }
 0x12e   : > { %v816_v1 = vrot.slane %v815_v62, 1  ;;  %v868_v2 = vrot.slane %v867_v61, 1  ;;  %v804_v4 = vadd.f32 %v803_v60, %v802_v55 }
 0x12f   : > { %v880_v3 = vadd.f32 %v879_v0, %v878_v59 }
 0x130   : > { %v817_v5 = vadd.f32 %v816_v1, %v815_v62  ;;  %v869_v9 = vadd.f32 %v868_v2, %v867_v61 }
 0x131   : > { %v881_v7 = vrot.slane %v880_v3, 1 }
 0x132   : > { %v820_v8 = vcombine.low %v804_v4, %v817_v5 }
 0x133   : > { %v882_v10 = vadd.f32 %v881_v7, %v880_v3 }
 0x134   : > { %v827_v11 = vrot.slane %v820_v8, %v826_v6 }
 0x135   : > { %v885_v12 = vcombine.low %v869_v9, %v882_v10 }
 0x136   : > { %v834_v13 = vrot.slane %v827_v11, %v826_v6 }
 0x137   : > { %v892_v14 = vrot.slane %v885_v12, %v826_v6 }
 0x138   : > { %840 = vst.msk [vmem:[%s325_s6] sm:$0x3] %vm838_vm0, %v834_v13 }
 0x139   : > { %v899_v15 = vrot.slane %v892_v14, %v826_v6 }
 0x13b   : > { %901 = vst.msk [vmem:[%s334_s9] sm:$0x3] %vm838_vm0, %v899_v15 }
 0x13c PF: > { %s15_s17 = sadd.s32 1, %s1317_s17   ;;  %s1517_s15 = smov %s1313_s16 }
 0x13d   : > { %p12_p6 = scmp.ge.s32.totalorder %s15_s17, 4   ;;  %s1518_s16 = smov %s1520_s18 }
 0x13f   :  { %14 = sbr.rel (!%p12_p6) target bundleno = 2 (0x2), region = 93 }

// kernel: basic_block_forward.9
= control target key start
LH: loop header
LB: loop body
LE: loop exit
PB: predicated region body
PF: predicated region fallthrough
CT: control target
= control target key end

     0   :  { %s886_s21 = smov 0   ;;  %s888_s22 = smov 0   ;;  %s1056_s0 = inlined_call_operand.vmem [shape: bf16[128,256], index: 0, kind: input, shape index: {}]   ;;  %s1057_s1 = inlined_call_operand.vmem [shape: f32[1,256], index: 1, kind: input, shape index: {}]   ;;  %s1058_s2 = inlined_call_operand.vmem [shape: f32[1,256], index: 2, kind: input, shape index: {}]   ;;  %s1059_s3 = inlined_call_operand.vmem [shape: bf16[128,256], index: 3, kind: input, shape index: {}]   ;;  %s1060_s4 = inlined_call_operand.vmem [shape: f32[1,256], index: 4, kind: input, shape index: {}]   ;;  %s1061_s5 = inlined_call_operand.vmem [shape: f32[1,256], index: 5, kind: input, shape index: {}]   ;;  %s1062_s6 = inlined_call_operand.vmem [shape: f32[128,256], index: 6, kind: output, shape index: {}]  }
   0x1   :  { %s890_s23 = smov 0  }
   0x2 LB: > { %s28_s24 = sadd.s32 1, %s845_s22  ;;  %p788_p0 = scmp.ge.s32.totalorder %s849_s23, 1  ;;  %s849_s23 = sphi %s890_s23, %s16_s23   ;;  %s845_s22 = sphi %s888_s22, %s1064_s22   ;;  %s841_s21 = sphi %s886_s21, %s1063_s21  }
   0x3   : > { %p30_p1 = scmp.ge.s32.totalorder %s28_s24, 2  ;;  %p294_p2 = scmp.lt.s32.totalorder %s849_s23, 3 }
   0x5   : > { %s1066_s24 = smov (%p30_p1, %s28_s24), 0  ;;  %p295_p3 = pnand %p788_p0, %p294_p2 }
   0x6   : > { %s789_s25 = sshll.u32 (!%p295_p3), %s841_s21, 3 }
   0x7   : > { %298 = sbr.rel (%p295_p3) target bundleno = 57 (0x39), region = 44  ;;  %p362_p4 = scmp.lt.s32.totalorder (!%p295_p3), %s789_s25, 15 }
   0xc   : > { %v442_v0 = vlaneseq  ;;  %v440_v1 = vld [vmem:[%s1057_s1] sm:$0x3]  ;;  %s1068_s25 = smov (!%p362_p4, %s789_s25), 15 }
   0xd   : > { %v468_v3 = vld [vmem:[%s1058_s2] sm:$0x3]  ;;  %s800_s10 = sshll.u32 %s1068_s25, 3  ;;  %s802_s17 = sshll.u32 %s1068_s25, 4 }
   0xe   : > { %v443_v2 = vshrl.u32 %v442_v0, 7  ;;  %v520_v4 = vld [vmem:[%s1060_s4] sm:$0x3]  ;;  %s922_s13 = scalar_lea.vmem %s1056_s0, %s800_s10  ;;  %s927_s16 = scalar_lea.vmem %s1059_s3, %s800_s10 }
   0xf   : > { %v548_v5 = vld [vmem:[%s1061_s5] sm:$0x3]  ;;  %v417_v18 = vld [vmem:[%s922_s13 + $0x8] sm:$0xff]  ;;  %v418_v36 = vld [vmem:[%s922_s13 + $0x10] sm:$0xff]  ;;  %s971_s20 = scalar_lea.vmem %s1062_s6, %s802_s17 }
  0x10   : > { %v444_v6 = vsub.s32 0, %v443_v2  ;;  %v448_v7 = vsub.s32 1, %v443_v2  ;;  %v416_v12 = vld [vmem:[%s922_s13] sm:$0xff]  ;;  %v497_v23 = vld [vmem:[%s927_s16 + $0x8] sm:$0xff]  ;;  %v426_v24 = vunpack.c.l.bf16 %v417_v18  ;;  %v427_v26 = vunpack.c.h.bf16 %v417_v18  ;;  %v498_v37 = vld [vmem:[%s927_s16 + $0x10] sm:$0xff] }
  0x11   : > { %v496_v13 = vld [vmem:[%s927_s16] sm:$0xff]  ;;  %v424_v19 = vunpack.c.l.bf16 %v416_v12  ;;  %v425_v21 = vunpack.c.h.bf16 %v416_v12  ;;  %v506_v25 = vunpack.c.l.bf16 %v497_v23  ;;  %v507_v27 = vunpack.c.h.bf16 %v497_v23  ;;  %v419_v54 = vld [vmem:[%s922_s13 + $0x18] sm:$0xff] }
  0x12   : > { %v929_v8 = vrot.slane %v440_v1, %v444_v6  ;;  %v931_v9 = vrot.slane %v468_v3, %v444_v6  ;;  %v933_v10 = vrot.slane %v520_v4, %v444_v6  ;;  %v935_v11 = vrot.slane %v548_v5, %v444_v6  ;;  %v499_v55 = vld [vmem:[%s927_s16 + $0x18] sm:$0xff]  ;;  %v420_v0 = vld [vmem:[%s922_s13 + $0x20] sm:$0xff] }
  0x13   : > { %v939_v14 = vrot.slane %v440_v1, %v448_v7  ;;  %v941_v15 = vrot.slane %v468_v3, %v448_v7  ;;  %v943_v16 = vrot.slane %v520_v4, %v448_v7  ;;  %v945_v17 = vrot.slane %v548_v5, %v448_v7  ;;  %v500_v5 = vld [vmem:[%s927_s16 + $0x20] sm:$0xff] }
  0x14   : > { %v504_v20 = vunpack.c.l.bf16 %v496_v13  ;;  %v505_v22 = vunpack.c.h.bf16 %v496_v13  ;;  %v452_v28 = vmul.f32 %v929_v8, %v424_v19  ;;  %v454_v32 = vmul.f32 %v929_v8, %v426_v24 }
  0x15   : > { %v453_v30 = vmul.f32 %v939_v14, %v425_v21  ;;  %v534_v33 = vmul.f32 %v933_v10, %v506_v25  ;;  %v455_v34 = vmul.f32 %v939_v14, %v427_v26  ;;  %v535_v35 = vmul.f32 %v943_v16, %v507_v27 }
  0x16   : > { %v532_v29 = vmul.f32 %v933_v10, %v504_v20  ;;  %v533_v31 = vmul.f32 %v943_v16, %v505_v22  ;;  %v480_v38 = vadd.f32 %v931_v9, %v452_v28  ;;  %v482_v42 = vadd.f32 %v931_v9, %v454_v32 }
  0x17   : > { %v481_v40 = vadd.f32 %v941_v15, %v453_v30  ;;  %v562_v43 = vadd.f32 %v935_v11, %v534_v33  ;;  %v483_v44 = vadd.f32 %v941_v15, %v455_v34  ;;  %v563_v45 = vadd.f32 %v945_v17, %v535_v35  ;;  %v421_v30 = vld [vmem:[%s922_s13 + $0x28] sm:$0xff] }
  0x18   : > { %v560_v39 = vadd.f32 %v935_v11, %v532_v29  ;;  %v561_v41 = vadd.f32 %v945_v17, %v533_v31  ;;  %v428_v48 = vunpack.c.l.bf16 %v418_v36  ;;  %v508_v49 = vunpack.c.l.bf16 %v498_v37  ;;  %v501_v31 = vld [vmem:[%s927_s16 + $0x28] sm:$0xff] }
  0x19   : > { %v578_v50 = vadd.f32 %v562_v43, %v482_v42  ;;  %v579_v51 = vadd.f32 %v563_v45, %v483_v44  ;;  %v429_v52 = vunpack.c.h.bf16 %v418_v36  ;;  %v509_v53 = vunpack.c.h.bf16 %v498_v37 }
  0x1a   : > { %v576_v46 = vadd.f32 %v560_v39, %v480_v38  ;;  %v577_v47 = vadd.f32 %v561_v41, %v481_v40  ;;  %v456_v58 = vmul.f32 %v929_v8, %v428_v48  ;;  %v536_v59 = vmul.f32 %v933_v10, %v508_v49  ;;  %v422_v48 = vld [vmem:[%s922_s13 + $0x30] sm:$0xff] }
  0x1b   : > { %v594_v60 = vmax.f32 %v578_v50, 0.0  ;;  %v595_v61 = vmax.f32 %v579_v51, 0.0  ;;  %v457_v62 = vmul.f32 %v939_v14, %v429_v52  ;;  %v537_v63 = vmul.f32 %v943_v16, %v509_v53  ;;  %v502_v53 = vld [vmem:[%s927_s16 + $0x30] sm:$0xff] }
  0x1c   : > { %v592_v56 = vmax.f32 %v576_v46, 0.0  ;;  %v593_v57 = vmax.f32 %v577_v47, 0.0  ;;  %v484_v1 = vadd.f32 %v931_v9, %v456_v58  ;;  %v564_v2 = vadd.f32 %v935_v11, %v536_v59 }
  0x1d   : > { %v430_v3 = vunpack.c.l.bf16 %v419_v54  ;;  %v510_v4 = vunpack.c.l.bf16 %v499_v55  ;;  %610 = vst [vmem:[%s971_s20 + $0x10] sm:$0xff] %v594_v60  ;;  %611 = vst [vmem:[%s971_s20 + $0x18] sm:$0xff] %v595_v61  ;;  %v485_v6 = vadd.f32 %v941_v15, %v457_v62  ;;  %v565_v7 = vadd.f32 %v945_v17, %v537_v63  ;;  %v423_v62 = vld [vmem:[%s922_s13 + $0x38] sm:$0xff] }
  0x1e   : > { %608 = vst [vmem:[%s971_s20] sm:$0xff] %v592_v56  ;;  %609 = vst [vmem:[%s971_s20 + $0x8] sm:$0xff] %v593_v57  ;;  %v431_v12 = vunpack.c.h.bf16 %v419_v54  ;;  %v511_v13 = vunpack.c.h.bf16 %v499_v55  ;;  %v580_v18 = vadd.f32 %v564_v2, %v484_v1  ;;  %v432_v21 = vunpack.c.l.bf16 %v420_v0 }
  0x1f   : > { %v458_v19 = vmul.f32 %v929_v8, %v430_v3  ;;  %v538_v20 = vmul.f32 %v933_v10, %v510_v4  ;;  %v581_v22 = vadd.f32 %v565_v7, %v485_v6  ;;  %v512_v25 = vunpack.c.l.bf16 %v500_v5  ;;  %v503_v7 = vld [vmem:[%s927_s16 + $0x38] sm:$0xff] }
  0x20   : > { %v459_v23 = vmul.f32 %v939_v14, %v431_v12  ;;  %v539_v24 = vmul.f32 %v943_v16, %v511_v13  ;;  %v596_v26 = vmax.f32 %v580_v18, 0.0  ;;  %v460_v29 = vmul.f32 %v929_v8, %v432_v21 }
  0x21   : > { %v486_v27 = vadd.f32 %v931_v9, %v458_v19  ;;  %v566_v28 = vadd.f32 %v935_v11, %v538_v20  ;;  %v597_v32 = vmax.f32 %v581_v22, 0.0  ;;  %v540_v35 = vmul.f32 %v933_v10, %v512_v25 }
  0x22   : > { %v487_v33 = vadd.f32 %v941_v15, %v459_v23  ;;  %v567_v34 = vadd.f32 %v945_v17, %v539_v24  ;;  %612 = vst [vmem:[%s971_s20 + $0x20] sm:$0xff] %v596_v26  ;;  %v488_v37 = vadd.f32 %v931_v9, %v460_v29  ;;  %v433_v38 = vunpack.c.h.bf16 %v420_v0 }
  0x23   : > { %v582_v36 = vadd.f32 %v566_v28, %v486_v27  ;;  %v513_v39 = vunpack.c.h.bf16 %v500_v5  ;;  %613 = vst [vmem:[%s971_s20 + $0x28] sm:$0xff] %v597_v32  ;;  %v568_v41 = vadd.f32 %v935_v11, %v540_v35  ;;  %v434_v42 = vunpack.c.l.bf16 %v421_v30 }
  0x24   : > { %v583_v40 = vadd.f32 %v567_v34, %v487_v33  ;;  %v514_v43 = vunpack.c.l.bf16 %v501_v31  ;;  %v461_v45 = vmul.f32 %v939_v14, %v433_v38  ;;  %v435_v47 = vunpack.c.h.bf16 %v421_v30 }
  0x25   : > { %v598_v44 = vmax.f32 %v582_v36, 0.0  ;;  %v541_v46 = vmul.f32 %v943_v16, %v513_v39  ;;  %v584_v50 = vadd.f32 %v568_v41, %v488_v37  ;;  %v462_v51 = vmul.f32 %v929_v8, %v434_v42 }
  0x26   : > { %v599_v49 = vmax.f32 %v583_v40, 0.0  ;;  %v542_v52 = vmul.f32 %v933_v10, %v514_v43  ;;  %v489_v54 = vadd.f32 %v941_v15, %v461_v45  ;;  %v463_v56 = vmul.f32 %v939_v14, %v435_v47 }
  0x27   : > { %614 = vst [vmem:[%s971_s20 + $0x30] sm:$0xff] %v598_v44  ;;  %v569_v55 = vadd.f32 %v945_v17, %v541_v46  ;;  %v515_v57 = vunpack.c.h.bf16 %v501_v31  ;;  %v600_v58 = vmax.f32 %v584_v50, 0.0  ;;  %v490_v59 = vadd.f32 %v931_v9, %v462_v51 }
  0x28   : > { %615 = vst [vmem:[%s971_s20 + $0x38] sm:$0xff] %v599_v49  ;;  %v570_v60 = vadd.f32 %v935_v11, %v542_v52  ;;  %v436_v61 = vunpack.c.l.bf16 %v422_v48  ;;  %v491_v0 = vadd.f32 %v941_v15, %v463_v56  ;;  %v516_v2 = vunpack.c.l.bf16 %v502_v53 }
  0x29   : > { %v585_v63 = vadd.f32 %v569_v55, %v489_v54  ;;  %v543_v1 = vmul.f32 %v943_v16, %v515_v57  ;;  %616 = vst [vmem:[%s971_s20 + $0x40] sm:$0xff] %v600_v58  ;;  %v437_v5 = vunpack.c.h.bf16 %v422_v48  ;;  %v517_v6 = vunpack.c.h.bf16 %v502_v53 }
  0x2a   : > { %v586_v3 = vadd.f32 %v570_v60, %v490_v59  ;;  %v464_v4 = vmul.f32 %v929_v8, %v436_v61  ;;  %v544_v18 = vmul.f32 %v933_v10, %v516_v2  ;;  %v438_v19 = vunpack.c.l.bf16 %v423_v62 }
  0x2b   : > { %v601_v12 = vmax.f32 %v585_v63, 0.0  ;;  %v571_v13 = vadd.f32 %v945_v17, %v543_v1  ;;  %v465_v22 = vmul.f32 %v939_v14, %v437_v5  ;;  %v545_v23 = vmul.f32 %v943_v16, %v517_v6 }
  0x2c   : > { %v602_v20 = vmax.f32 %v586_v3, 0.0  ;;  %v492_v21 = vadd.f32 %v931_v9, %v464_v4  ;;  %v572_v25 = vadd.f32 %v935_v11, %v544_v18  ;;  %v466_v26 = vmul.f32 %v929_v8, %v438_v19 }
  0x2d   : > { %617 = vst [vmem:[%s971_s20 + $0x48] sm:$0xff] %v601_v12  ;;  %v587_v24 = vadd.f32 %v571_v13, %v491_v0  ;;  %v518_v27 = vunpack.c.l.bf16 %v503_v7  ;;  %v493_v28 = vadd.f32 %v941_v15, %v465_v22  ;;  %v573_v29 = vadd.f32 %v945_v17, %v545_v23 }
  0x2e   : > { %618 = vst [vmem:[%s971_s20 + $0x50] sm:$0xff] %v602_v20  ;;  %v439_v30 = vunpack.c.h.bf16 %v423_v62  ;;  %v519_v31 = vunpack.c.h.bf16 %v503_v7  ;;  %v588_v33 = vadd.f32 %v572_v25, %v492_v21  ;;  %v494_v34 = vadd.f32 %v931_v9, %v466_v26 }
  0x2f   : > { %v603_v32 = vmax.f32 %v587_v24, 0.0  ;;  %v546_v35 = vmul.f32 %v933_v10, %v518_v27  ;;  %v589_v36 = vadd.f32 %v573_v29, %v493_v28 }
  0x30   : > { %v467_v8 = vmul.f32 %v939_v14, %v439_v30  ;;  %v547_v37 = vmul.f32 %v943_v16, %v519_v31  ;;  %v604_v38 = vmax.f32 %v588_v33, 0.0 }
  0x31   : > { %619 = vst [vmem:[%s971_s20 + $0x58] sm:$0xff] %v603_v32  ;;  %v574_v39 = vadd.f32 %v935_v11, %v546_v35  ;;  %v605_v40 = vmax.f32 %v589_v36, 0.0 }
  0x32   : > { %v495_v41 = vadd.f32 %v941_v15, %v467_v8  ;;  %v575_v42 = vadd.f32 %v945_v17, %v547_v37  ;;  %620 = vst [vmem:[%s971_s20 + $0x60] sm:$0xff] %v604_v38 }
  0x33   : > { %v590_v9 = vadd.f32 %v574_v39, %v494_v34  ;;  %621 = vst [vmem:[%s971_s20 + $0x68] sm:$0xff] %v605_v40 }
  0x34   : > { %v591_v10 = vadd.f32 %v575_v42, %v495_v41 }
  0x35   : > { %v606_v43 = vmax.f32 %v590_v9, 0.0 }
  0x36   : > { %v607_v44 = vmax.f32 %v591_v10, 0.0 }
  0x37   : > { %622 = vst [vmem:[%s971_s20 + $0x70] sm:$0xff] %v606_v43 }
  0x38   : > { %623 = vst [vmem:[%s971_s20 + $0x78] sm:$0xff] %v607_v44 }
  0x39 PF: > { %s16_s23 = sadd.s32 1, %s849_s23   ;;  %s1063_s21 = smov %s845_s22 }
  0x3a   : > { %p13_p5 = scmp.ge.s32.totalorder %s16_s23, 4   ;;  %s1064_s22 = smov %s1066_s24 }
  0x3c   :  { %15 = sbr.rel (!%p13_p5) target bundleno = 2 (0x2), region = 89 }

</bundles_post_ra>
